<compile_context>
chip_gen: v7x
topology: tpu7x:2x2x1
jax: 0.10.0
libtpu: 0.0.40
codegen_flags: <defaults>
</compile_context>

<pallas_src>
import math

import jax
import jax.numpy as jnp
from jax.experimental import pallas as pl
from jax.experimental.pallas import tpu as pltpu


def _round_up(n, m):
    return ((n + m - 1) // m) * m


# ---------------------------------------------------------------------------
# Architecture bookkeeping (mirrors DepMapPairsEncoder.__init__)
# ---------------------------------------------------------------------------
def _layer_dims(input_size, n_layers, contraction_ratio):
    """Per-layer (in, out) sizes for one contraction stack."""
    dims = []
    for _ in range(n_layers):
        out = max(int(input_size / contraction_ratio), 10)
        dims.append((input_size, out))
        input_size = out
    return dims


def build_param_shapes(omics_lens, ppi_len, n_hiddens_level0=3,
                       n_hiddens_top=3, contraction_ratio=10):
    """Flat list of (in, out) shapes in the exact order the forward uses them."""
    shapes = []
    top_layer_input_size = 0
    for L in omics_lens:
        dims = _layer_dims(L, n_hiddens_level0, contraction_ratio)
        shapes.extend(dims)
        top_layer_input_size += dims[-1][1]
    dims = _layer_dims(ppi_len, n_hiddens_level0, contraction_ratio)
    shapes.extend(dims)
    top_layer_input_size += dims[-1][1]
    dims = _layer_dims(top_layer_input_size, n_hiddens_top, contraction_ratio)
    shapes.extend(dims)
    top_layer_output_size = dims[-1][1]
    shapes.append((top_layer_output_size, 1))      # final_linear
    return shapes


def init_params(key, shapes):
    """PyTorch-Linear-style init: U(-1/sqrt(fan_in), 1/sqrt(fan_in))."""
    params = []
    for (fin, fout) in shapes:
        key, kw, kb = jax.random.split(key, 3)
        bound = 1.0 / math.sqrt(fin)
        w = jax.random.uniform(kw, (fin, fout), jnp.float32, -bound, bound)
        b = jax.random.uniform(kb, (1, fout), jnp.float32, -bound, bound)
        params.append(w)
        params.append(b)
    return params


# ---------------------------------------------------------------------------
# Wrapper-side parameter fusion:
#   block-diagonal level-0 weights, lane-padded widths, stacked layer weights,
#   single packed bias / final-row array.
# ---------------------------------------------------------------------------
def fuse_params(params, omics_lens, ppi_len, n_hiddens_level0, n_hiddens_top,
                contraction_ratio, f_pad):
    branch_dims = [_layer_dims(L, n_hiddens_level0, contraction_ratio)
                   for L in list(omics_lens) + [ppi_len]]

    # params is flat [w, b, w, b, ...] in branch -> ppi -> top -> final order.
    pos = 0
    branch_layers = []
    for dims in branch_dims:
        layers = []
        for _ in dims:
            layers.append((params[pos], params[pos + 1]))
            pos += 2
        branch_layers.append(layers)
    top_layers = []
    for _ in range(n_hiddens_top):
        top_layers.append((params[pos], params[pos + 1]))
        pos += 2
    w_final, b_final = params[pos], params[pos + 1]

    # -- raw (unpadded) fused tanh layers: block-diagonal for level-0 --------
    raw_ws, raw_bs = [], []
    for j in range(n_hiddens_level0):
        ws = [bl[j][0] for bl in branch_layers]
        bs = [bl[j][1] for bl in branch_layers]
        k_tot = sum(int(w.shape[0]) for w in ws)
        n_tot = sum(int(w.shape[1]) for w in ws)
        W = jnp.zeros((k_tot, n_tot), jnp.float32)
        r = c = 0
        for w in ws:
            W = W.at[r:r + w.shape[0], c:c + w.shape[1]].set(w)
            r += int(w.shape[0])
            c += int(w.shape[1])
        raw_ws.append(W)
        raw_bs.append(jnp.concatenate([b.reshape(-1) for b in bs]))
    for (w, b) in top_layers:
        raw_ws.append(w.astype(jnp.float32))
        raw_bs.append(b.reshape(-1))

    n_tanh = len(raw_ws)

    # Common lane-aligned hidden width so every post-first layer is a
    # full-vreg (hidden_pad x hidden_pad) matmul (padded lanes stay 0).
    widths = [int(w.shape[1]) for w in raw_ws]
    widths += [int(w.shape[0]) for w in raw_ws[1:]]
    widths.append(int(w_final.shape[0]))
    hidden_pad = _round_up(max(widths), 128)

    # First fused layer: (F_pad, hidden_pad), K padded 756 -> 768.
    w0 = raw_ws[0]
    w0 = jnp.pad(w0, ((0, f_pad - int(w0.shape[0])),
                      (0, hidden_pad - int(w0.shape[1]))))

    # Remaining tanh layers stacked into one array.
    n_rest = max(n_tanh - 1, 1)
    w_stack = jnp.zeros((n_rest, hidden_pad, hidden_pad), jnp.float32)
    for k in range(1, n_tanh):
        w = raw_ws[k]
        w_stack = w_stack.at[k - 1, :w.shape[0], :w.shape[1]].set(w)

    # Pack: rows 0..n_tanh-1 tanh biases, row n_tanh final weight row,
    # row n_tanh+1 final scalar bias at lane 0.
    pack = jnp.zeros((n_tanh + 2, hidden_pad), jnp.float32)
    for k, b in enumerate(raw_bs):
        pack = pack.at[k, :b.shape[0]].set(b)
    wf = w_final.reshape(-1)
    pack = pack.at[n_tanh, :wf.shape[0]].set(wf)
    pack = pack.at[n_tanh + 1, 0].set(b_final.reshape(-1)[0])

    return w0, w_stack, pack, n_tanh


# ---------------------------------------------------------------------------
# Pallas kernel
# ---------------------------------------------------------------------------
def make_kernel(n_tanh):
    def kernel(x_ref, w0_ref, wstack_ref, pack_ref, out_ref):
        # Layer 0: one big MXU matmul over the padded feature width.
        h = jnp.tanh(
            jnp.dot(x_ref[...], w0_ref[...],
                    preferred_element_type=jnp.float32)
            + pack_ref[0:1, :])
        # Layers 1..n_tanh-1: full-vreg (hidden_pad x hidden_pad) matmuls.
        for k in range(1, n_tanh):
            h = jnp.tanh(
                jnp.dot(h, wstack_ref[k - 1],
                        preferred_element_type=jnp.float32)
                + pack_ref[k:k + 1, :])
        # Final linear (K=10, N=1): VPU multiply + XLU lane reduction, not MXU.
        wf = pack_ref[n_tanh:n_tanh + 1, :]            # (1, hidden_pad)
        bf = pack_ref[n_tanh + 1:n_tanh + 2, 0:1]      # (1, 1)
        out_ref[...] = jnp.sum(h * wf, axis=-1, keepdims=True) + bf

    return kernel


def depmap_pairs_encoder(x, params, omics_slices, ppi_slice,
                         n_hiddens_level0=3, n_hiddens_top=3,
                         contraction_ratio=10, batch_tile=256):
    # ---- wrapper-side layout plumbing (one-time, XLA) ----------------------
    # Gather branch features contiguously (branch order == block-diag order)
    # and pad the feature dim to a multiple of 128.
    branches = [x[:, s:s + l] for (s, l) in list(omics_slices) + [ppi_slice]]
    xc = jnp.concatenate(branches, axis=1).astype(jnp.float32)
    B, F = xc.shape
    F_pad = _round_up(F, 128)
    if F_pad > F:
        xc = jnp.pad(xc, ((0, 0), (0, F_pad - F)))

    omics_lens = [l for (_, l) in omics_slices]
    w0, w_stack, pack, n_tanh = fuse_params(
        params, omics_lens, ppi_slice[1],
        n_hiddens_level0, n_hiddens_top, contraction_ratio, F_pad)

    # ---- batch tiling: 1-D "parallel" grid over rows -----------------------
    tm = batch_tile if B >= batch_tile else _round_up(B, 8)
    B_pad = _round_up(B, tm)
    if B_pad > B:
        xc = jnp.pad(xc, ((0, B_pad - B), (0, 0)))
    grid = (B_pad // tm,)

    kernel = make_kernel(n_tanh)
    out = pl.pallas_call(
        kernel,
        out_shape=jax.ShapeDtypeStruct((B_pad, 1), jnp.float32),
        grid_spec=pltpu.PrefetchScalarGridSpec(
            num_scalar_prefetch=0,
            grid=grid,
            in_specs=[
                pl.BlockSpec((tm, F_pad), lambda i: (i, 0)),
                # Parameters: full-array blocks, constant index map so they
                # stay VMEM-resident across grid steps (no per-step DMA).
                pl.BlockSpec(w0.shape, lambda i: (0, 0)),
                pl.BlockSpec(w_stack.shape, lambda i: (0, 0, 0)),
                pl.BlockSpec(pack.shape, lambda i: (0, 0)),
            ],
            out_specs=pl.BlockSpec((tm, 1), lambda i: (i, 0)),
        ),
        compiler_params=pltpu.CompilerParams(
            dimension_semantics=("parallel",)),
    )(xc, w0, w_stack, pack)

    return out[:B, 0]                            # .flatten() in torch


# ---------------------------------------------------------------------------
# Pure-JAX reference (unfused, mirrors the PyTorch forward exactly)
# ---------------------------------------------------------------------------
def reference_forward(x, params, omics_slices, ppi_slice,
                      n_hiddens_level0=3, n_hiddens_top=3):
    pos = [0]

    def next_wb():
        w, b = params[pos[0]], params[pos[0] + 1]
        pos[0] += 2
        return w, b

    feats = []
    for (start, length) in list(omics_slices) + [ppi_slice]:
        h = x[:, start:start + length]
        for _ in range(n_hiddens_level0):
            w, b = next_wb()
            h = jnp.tanh(h @ w + b)
        feats.append(h)
    h = jnp.concatenate(feats, axis=1)
    for _ in range(n_hiddens_top):
        w, b = next_wb()
        h = jnp.tanh(h @ w + b)
    w, b = next_wb()
    return (h @ w + b).reshape(-1)


# ---------------------------------------------------------------------------
if __name__ == "__main__":
    # Synthetic index layout (mirrors the omics / ppi "narrow" slices):
    #   omics block 0: features [0, 300)
    #   omics block 1: features [300, 500)
    #   ppi block    : features [500, 756)
    omics_matrix_idx_list = [list(range(0, 300)), list(range(300, 500))]
    ppi_matrix_idx = list(range(500, 756))

    omics_slices = [(int(idx[0]), len(idx)) for idx in omics_matrix_idx_list]
    ppi_slice = (int(ppi_matrix_idx[0]), len(ppi_matrix_idx))

    n_hiddens_level0 = 3
    n_hiddens_top = 3
    contraction_ratio = 10

    shapes = build_param_shapes(
        [len(i) for i in omics_matrix_idx_list], len(ppi_matrix_idx),
        n_hiddens_level0, n_hiddens_top, contraction_ratio)

    key = jax.random.PRNGKey(0)
    key, kx = jax.random.split(key)

    B = 8
    F = ppi_slice[0] + ppi_slice[1]                       # 756 total features
    x = jax.random.normal(kx, (B, F), dtype=jnp.float32)
    params = init_params(key, shapes)

    y = depmap_pairs_encoder(x, params, omics_slices, ppi_slice,
                             n_hiddens_level0, n_hiddens_top, contraction_ratio)
    y = jax.block_until_ready(y)

    y_ref = reference_forward(x, params, omics_slices, ppi_slice,
                              n_hiddens_level0, n_hiddens_top)
    assert y.shape == (B,), y.shape
    assert jnp.allclose(y, y_ref, atol=1e-4, rtol=1e-4), (y, y_ref)

    # TODO(synk): for very large-batch v6e/v7x runs, optionally cast the fused
    # weights/activations to bfloat16 (keep preferred_element_type=f32) and
    # sweep batch_tile.
    print("KERNEL_OK")
</pallas_src>

<mosaic_0001>
module attributes {stable_mosaic.version = 11 : i64} {
  func.func @kernel(%arg0: i32, %arg1: memref<8x768xf32, #tpu.memory_space<vmem>>, %arg2: memref<768x128xf32, #tpu.memory_space<vmem>>, %arg3: memref<5x128x128xf32, #tpu.memory_space<vmem>>, %arg4: memref<8x128xf32, #tpu.memory_space<vmem>>, %arg5: memref<8x1xf32, #tpu.memory_space<vmem>>) attributes {dimension_semantics = [#tpu.dimension_semantics<parallel>], iteration_bounds = array<i64: 1>, scalar_prefetch = 0 : i64, scratch_operands = 0 : i64, tpu.core_type = #tpu.core_type<tc>, window_params = [{transform_indices = @transform_0, window_bounds = array<i64: 8, 768>}, {pipeline_mode = #tpu.pipeline_mode<synchronous>, transform_indices = @transform_1, window_bounds = array<i64: 768, 128>}, {pipeline_mode = #tpu.pipeline_mode<synchronous>, transform_indices = @transform_2, window_bounds = array<i64: 5, 128, 128>}, {pipeline_mode = #tpu.pipeline_mode<synchronous>, transform_indices = @transform_3, window_bounds = array<i64: 8, 128>}, {transform_indices = @transform_4, window_bounds = array<i64: 8, 1>}]} {
    %c0 = arith.constant 0 : index
    %c0_0 = arith.constant 0 : index
    %0 = vector.load %arg1[%c0, %c0_0] : memref<8x768xf32, #tpu.memory_space<vmem>>, vector<8x768xf32>
    %c0_1 = arith.constant 0 : index
    %c0_2 = arith.constant 0 : index
    %1 = vector.load %arg2[%c0_1, %c0_2] : memref<768x128xf32, #tpu.memory_space<vmem>>, vector<768x128xf32>
    %cst = arith.constant dense<0.000000e+00> : vector<8x128xf32>
    %2 = tpu.matmul %0, %1, %cst {dimension_numbers = #tpu.dot_dimension_numbers<[1], [0], [0], [1], [0, 0, 1, 1], [], []>} : vector<8x768xf32>, vector<768x128xf32>, vector<8x128xf32> -> vector<8x128xf32>
    %c0_3 = arith.constant 0 : index
    %c0_4 = arith.constant 0 : index
    %3 = vector.load %arg4[%c0_3, %c0_4] : memref<8x128xf32, #tpu.memory_space<vmem>>, vector<1x128xf32>
    %4 = vector.broadcast %3 : vector<1x128xf32> to vector<8x128xf32>
    %5 = arith.addf %2, %4 : vector<8x128xf32>
    %6 = math.tanh %5 : vector<8x128xf32>
    %c0_5 = arith.constant 0 : index
    %c0_6 = arith.constant 0 : index
    %c0_7 = arith.constant 0 : index
    %7 = vector.load %arg3[%c0_5, %c0_6, %c0_7] : memref<5x128x128xf32, #tpu.memory_space<vmem>>, vector<1x128x128xf32>
    %8 = vector.shape_cast %7 : vector<1x128x128xf32> to vector<128x128xf32>
    %cst_8 = arith.constant dense<0.000000e+00> : vector<8x128xf32>
    %9 = tpu.matmul %6, %8, %cst_8 {dimension_numbers = #tpu.dot_dimension_numbers<[1], [0], [0], [1], [0, 0, 1, 1], [], []>} : vector<8x128xf32>, vector<128x128xf32>, vector<8x128xf32> -> vector<8x128xf32>
    %c1 = arith.constant 1 : index
    %c0_9 = arith.constant 0 : index
    %10 = vector.load %arg4[%c1, %c0_9] : memref<8x128xf32, #tpu.memory_space<vmem>>, vector<1x128xf32>
    %11 = vector.broadcast %10 : vector<1x128xf32> to vector<8x128xf32>
    %12 = arith.addf %9, %11 : vector<8x128xf32>
    %13 = math.tanh %12 : vector<8x128xf32>
    %c1_10 = arith.constant 1 : index
    %c0_11 = arith.constant 0 : index
    %c0_12 = arith.constant 0 : index
    %14 = vector.load %arg3[%c1_10, %c0_11, %c0_12] : memref<5x128x128xf32, #tpu.memory_space<vmem>>, vector<1x128x128xf32>
    %15 = vector.shape_cast %14 : vector<1x128x128xf32> to vector<128x128xf32>
    %cst_13 = arith.constant dense<0.000000e+00> : vector<8x128xf32>
    %16 = tpu.matmul %13, %15, %cst_13 {dimension_numbers = #tpu.dot_dimension_numbers<[1], [0], [0], [1], [0, 0, 1, 1], [], []>} : vector<8x128xf32>, vector<128x128xf32>, vector<8x128xf32> -> vector<8x128xf32>
    %c2 = arith.constant 2 : index
    %c0_14 = arith.constant 0 : index
    %17 = vector.load %arg4[%c2, %c0_14] : memref<8x128xf32, #tpu.memory_space<vmem>>, vector<1x128xf32>
    %18 = vector.broadcast %17 : vector<1x128xf32> to vector<8x128xf32>
    %19 = arith.addf %16, %18 : vector<8x128xf32>
    %20 = math.tanh %19 : vector<8x128xf32>
    %c2_15 = arith.constant 2 : index
    %c0_16 = arith.constant 0 : index
    %c0_17 = arith.constant 0 : index
    %21 = vector.load %arg3[%c2_15, %c0_16, %c0_17] : memref<5x128x128xf32, #tpu.memory_space<vmem>>, vector<1x128x128xf32>
    %22 = vector.shape_cast %21 : vector<1x128x128xf32> to vector<128x128xf32>
    %cst_18 = arith.constant dense<0.000000e+00> : vector<8x128xf32>
    %23 = tpu.matmul %20, %22, %cst_18 {dimension_numbers = #tpu.dot_dimension_numbers<[1], [0], [0], [1], [0, 0, 1, 1], [], []>} : vector<8x128xf32>, vector<128x128xf32>, vector<8x128xf32> -> vector<8x128xf32>
    %c3 = arith.constant 3 : index
    %c0_19 = arith.constant 0 : index
    %24 = vector.load %arg4[%c3, %c0_19] : memref<8x128xf32, #tpu.memory_space<vmem>>, vector<1x128xf32>
    %25 = vector.broadcast %24 : vector<1x128xf32> to vector<8x128xf32>
    %26 = arith.addf %23, %25 : vector<8x128xf32>
    %27 = math.tanh %26 : vector<8x128xf32>
    %c3_20 = arith.constant 3 : index
    %c0_21 = arith.constant 0 : index
    %c0_22 = arith.constant 0 : index
    %28 = vector.load %arg3[%c3_20, %c0_21, %c0_22] : memref<5x128x128xf32, #tpu.memory_space<vmem>>, vector<1x128x128xf32>
    %29 = vector.shape_cast %28 : vector<1x128x128xf32> to vector<128x128xf32>
    %cst_23 = arith.constant dense<0.000000e+00> : vector<8x128xf32>
    %30 = tpu.matmul %27, %29, %cst_23 {dimension_numbers = #tpu.dot_dimension_numbers<[1], [0], [0], [1], [0, 0, 1, 1], [], []>} : vector<8x128xf32>, vector<128x128xf32>, vector<8x128xf32> -> vector<8x128xf32>
    %c4 = arith.constant 4 : index
    %c0_24 = arith.constant 0 : index
    %31 = vector.load %arg4[%c4, %c0_24] : memref<8x128xf32, #tpu.memory_space<vmem>>, vector<1x128xf32>
    %32 = vector.broadcast %31 : vector<1x128xf32> to vector<8x128xf32>
    %33 = arith.addf %30, %32 : vector<8x128xf32>
    %34 = math.tanh %33 : vector<8x128xf32>
    %c4_25 = arith.constant 4 : index
    %c0_26 = arith.constant 0 : index
    %c0_27 = arith.constant 0 : index
    %35 = vector.load %arg3[%c4_25, %c0_26, %c0_27] : memref<5x128x128xf32, #tpu.memory_space<vmem>>, vector<1x128x128xf32>
    %36 = vector.shape_cast %35 : vector<1x128x128xf32> to vector<128x128xf32>
    %cst_28 = arith.constant dense<0.000000e+00> : vector<8x128xf32>
    %37 = tpu.matmul %34, %36, %cst_28 {dimension_numbers = #tpu.dot_dimension_numbers<[1], [0], [0], [1], [0, 0, 1, 1], [], []>} : vector<8x128xf32>, vector<128x128xf32>, vector<8x128xf32> -> vector<8x128xf32>
    %c5 = arith.constant 5 : index
    %c0_29 = arith.constant 0 : index
    %38 = vector.load %arg4[%c5, %c0_29] : memref<8x128xf32, #tpu.memory_space<vmem>>, vector<1x128xf32>
    %39 = vector.broadcast %38 : vector<1x128xf32> to vector<8x128xf32>
    %40 = arith.addf %37, %39 : vector<8x128xf32>
    %41 = math.tanh %40 : vector<8x128xf32>
    %c6 = arith.constant 6 : index
    %c0_30 = arith.constant 0 : index
    %42 = vector.load %arg4[%c6, %c0_30] : memref<8x128xf32, #tpu.memory_space<vmem>>, vector<1x128xf32>
    %c7 = arith.constant 7 : index
    %c0_31 = arith.constant 0 : index
    %43 = vector.load %arg4[%c7, %c0_31] : memref<8x128xf32, #tpu.memory_space<vmem>>, vector<1x1xf32>
    %44 = vector.broadcast %42 : vector<1x128xf32> to vector<8x128xf32>
    %45 = arith.mulf %41, %44 : vector<8x128xf32>
    %cst_32 = arith.constant dense<0.000000e+00> : vector<8xf32>
    %46 = vector.multi_reduction <add>, %45, %cst_32 [1] : vector<8x128xf32> to vector<8xf32>
    %47 = vector.shape_cast %46 : vector<8xf32> to vector<8x1xf32>
    %48 = vector.broadcast %43 : vector<1x1xf32> to vector<8x1xf32>
    %49 = arith.addf %47, %48 : vector<8x1xf32>
    %c0_33 = arith.constant 0 : index
    %c0_34 = arith.constant 0 : index
    %50 = vector.load %arg5[%c0_33, %c0_34] : memref<8x1xf32, #tpu.memory_space<vmem>>, vector<8x1xf32>
    tpu.vector_store %arg5[%c0_33, %c0_34], %49 {strides = array<i32>} : memref<8x1xf32, #tpu.memory_space<vmem>>, vector<8x1xf32>,
    return
  }
  func.func @transform_0(%arg0: i32) -> (i32, i32) {
    %c0_i32 = arith.constant 0 : i32
    %c0_i32_0 = arith.constant 0 : i32
    return %arg0, %c0_i32 : i32, i32
  }
  func.func @transform_1(%arg0: i32) -> (i32, i32) {
    %c0_i32 = arith.constant 0 : i32
    %c0_i32_0 = arith.constant 0 : i32
    %c0_i32_1 = arith.constant 0 : i32
    return %c0_i32, %c0_i32_0 : i32, i32
  }
  func.func @transform_2(%arg0: i32) -> (i32, i32, i32) {
    %c0_i32 = arith.constant 0 : i32
    %c0_i32_0 = arith.constant 0 : i32
    %c0_i32_1 = arith.constant 0 : i32
    %c0_i32_2 = arith.constant 0 : i32
    return %c0_i32, %c0_i32_0, %c0_i32_1 : i32, i32, i32
  }
  func.func @transform_3(%arg0: i32) -> (i32, i32) {
    %c0_i32 = arith.constant 0 : i32
    %c0_i32_0 = arith.constant 0 : i32
    %c0_i32_1 = arith.constant 0 : i32
    return %c0_i32, %c0_i32_0 : i32, i32
  }
  func.func @transform_4(%arg0: i32) -> (i32, i32) {
    %c0_i32 = arith.constant 0 : i32
    %c0_i32_0 = arith.constant 0 : i32
    return %arg0, %c0_i32 : i32, i32
  }
}

</mosaic_0001>

<bundles_post_ra>
// kernel: tpu_custom_call.1
= control target key start
LH: loop header
LB: loop body
LE: loop exit
PB: predicated region body
PF: predicated region fallthrough
CT: control target
= control target key end

     0   :  { %9 = vsyncpa [#allocation3], 0  ;;  %s1691_s0 = inlined_call_operand.hbm [shape: f32[8,768], index: 0, kind: input, shape index: {}]   ;;  %s1692_s1 = inlined_call_operand.hbm [shape: f32[768,128], index: 1, kind: input, shape index: {}]   ;;  %s1693_s2 = inlined_call_operand.hbm [shape: f32[5,128,128], index: 2, kind: input, shape index: {}]   ;;  %s1694_s3 = inlined_call_operand.vmem [shape: f32[8,128], index: 3, kind: input, shape index: {}]   ;;  %s1695_s4 = inlined_call_operand.vmem [shape: f32[8,1], index: 4, kind: output, shape index: {}]  }
   0x1   :  { %10 = vsyncpa [#allocation5], 0  ;;  %s1539_s15 = smov [#allocation4]   ;;  %s1469_s19 = scalar_lea.hbm %s1692_s1, 12288 }
   0x2   :  { %s26_s16 = sshll.u32 %s1539_s15, 4  ;;  %p1470_p0 = scmp.ne.s32.totalorder %s1692_s1, %s1469_s19  ;;  %s27_s16 = int_to_ptr.vmem [resolvable:$true] %s26_s16 }
   0x3   :  { %p1473_p1 = scmp.lt.u32.totalorder %s1469_s19, %s1692_s1 }
   0x5   :  { %p1475_p2 = pnand %p1473_p1, %p1470_p0 }
   0x7   :  { %1478 = shalt.err (!%p1475_p2)
}
   0x8   :  { %s1479_s24 = scalar_lea.vmem %s27_s16, 12288  ;;  %p1484_p4 = scmp.lt.s32.totalorder %s27_s16, %s27_s16 }
   0x9   :  { %p1480_p3 = scmp.ne.s32.totalorder %s27_s16, %s1479_s24  ;;  %p1485_p5 = scmp.lt.s32.totalorder %s1479_s24, %s1479_s24 }
   0xb   :  { %p1486_p6 = por %p1485_p5, %p1484_p4 }
   0xd   :  { %p1487_p7 = pnand %p1486_p6, %p1480_p3 }
   0xf   :  { %1490 = shalt.err (!%p1487_p7)
}
  0x10   :  { %s1540_s25 = smov 128   ;;  %s1541_s26 = smov 8  }
  0x11   :  { %32 = dma.hbm_to_vmem [thread:$0]  %s1692_s1, 12288, %s27_s16, [#allocation5], %s1540_s25, %s1540_s25, %s1541_s26  }
  0x12   :  { %s1542_s29 = smov [#allocation2]   ;;  %s1543_s5 = smov [#allocation6]  }
  0x13   :  { %s17_s30 = sshll.u32 %s1542_s29, 4  ;;  %s38_s6 = sshll.u32 %s1543_s5, 4  ;;  %s18_s30 = int_to_ptr.vmem [resolvable:$true] %s17_s30  ;;  %s39_s6 = int_to_ptr.vmem [resolvable:$true] %s38_s6 }
  0x14   :  { %s1491_s9 = scalar_lea.hbm %s1691_s0, 768 }
  0x15   :  { %p1492_p8 = scmp.ne.s32.totalorder %s1691_s0, %s1491_s9  ;;  %p1495_p9 = scmp.lt.u32.totalorder %s1491_s9, %s1691_s0 }
  0x17   :  { %p1497_p10 = pnand %p1495_p9, %p1492_p8 }
  0x19   :  { %1500 = shalt.err (!%p1497_p10)
}
  0x1a   :  { %s1501_s1 = scalar_lea.vmem %s18_s30, 768  ;;  %p1506_p12 = scmp.lt.s32.totalorder %s18_s30, %s18_s30 }
  0x1b   :  { %p1502_p11 = scmp.ne.s32.totalorder %s18_s30, %s1501_s1  ;;  %p1507_p13 = scmp.lt.s32.totalorder %s1501_s1, %s1501_s1 }
  0x1d   :  { %p1508_p0 = por %p1507_p13, %p1506_p12 }
  0x1f   :  { %p1509_p1 = pnand %p1508_p0, %p1502_p11 }
  0x21   :  { %1512 = shalt.err (!%p1509_p1)
}
  0x22   :  { %20 = dma.hbm_to_vmem [thread:$0]  %s1691_s0, 768, %s18_s30, [#allocation3]  }
  0x23   :  { %s1513_s18 = scalar_lea.hbm %s1693_s2, 10240 }
  0x24   :  { %p1514_p2 = scmp.ne.s32.totalorder %s1693_s2, %s1513_s18  ;;  %p1517_p3 = scmp.lt.u32.totalorder %s1513_s18, %s1693_s2 }
  0x26   :  { %p1519_p4 = pnand %p1517_p3, %p1514_p2 }
  0x28   :  { %1522 = shalt.err (!%p1519_p4)
}
  0x29   :  { %s1523_s23 = scalar_lea.vmem %s39_s6, 10240  ;;  %p1528_p6 = scmp.lt.s32.totalorder %s39_s6, %s39_s6 }
  0x2a   :  { %p1524_p5 = scmp.ne.s32.totalorder %s39_s6, %s1523_s23  ;;  %p1529_p7 = scmp.lt.s32.totalorder %s1523_s23, %s1523_s23 }
  0x2c   :  { %p1530_p8 = por %p1529_p7, %p1528_p6 }
  0x2e   :  { %p1531_p9 = pnand %p1530_p8, %p1524_p5 }
  0x30   :  { %1534 = shalt.err (!%p1531_p9)
}
  0x31   :  { %44 = dma.hbm_to_vmem [thread:$0]  %s1693_s2, 10240, %s39_s6, [#allocation5], %s1540_s25, %s1540_s25, %s1541_s26  }
  0x32   :  { %1535 = dma.done.wait [#allocation3], 768  }
  0x33   :  { %1536 = vsyncadd [#allocation3], 4294966528 }
  0x34   :  { %1537 = dma.done.wait [#allocation5], 22528  }
  0x35   :  { %1538 = vsyncadd [#allocation5], 4294944768  ;;  %v78_v0 = vld [vmem:[#allocation4 + $0x80] sm:$0xff]  ;;  %v79_v1 = vld [vmem:[#allocation4 + $0x88] sm:$0xff]  ;;  %vm1545_vm0 = vmmov 0   ;;  %vm852_vm1 = vcmask 7168  }
  0x36   :  { %v62_v2 = vld [vmem:[#allocation4] sm:$0xff]  ;;  %v1233_v3 = vpack.c.bf16 %v79_v1, %v78_v0  ;;  %v63_v4 = vld [vmem:[#allocation4 + $0x8] sm:$0xff]  ;;  %v80_v11 = vld [vmem:[#allocation4 + $0x90] sm:$0xff] }
  0x37   :  { %v110_v5 = vld [vmem:[#allocation4 + $0x180] sm:$0xff]  ;;  %v111_v6 = vld [vmem:[#allocation4 + $0x188] sm:$0xff]  ;;  %v1235_v7 = vpack.c.bf16 %v63_v4, %v62_v2  ;;  %v81_v13 = vld [vmem:[#allocation4 + $0x98] sm:$0xff] }
  0x38   :  { %v1265_v8 = vpack.c.bf16 %v111_v6, %v110_v5  ;;  %v94_v9 = vld [vmem:[#allocation4 + $0x100] sm:$0xff]  ;;  %v95_v10 = vld [vmem:[#allocation4 + $0x108] sm:$0xff]  ;;  %1234 = vmatprep.subr.bf16.mxu0 %v1233_v3  ;;  %v64_v14 = vld [vmem:[#allocation4 + $0x10] sm:$0xff]  ;;  %v1237_v16 = vpack.c.bf16 %v81_v13, %v80_v11 }
  0x39   :  { %v1267_v12 = vpack.c.bf16 %v95_v10, %v94_v9  ;;  %v65_v15 = vld [vmem:[#allocation4 + $0x18] sm:$0xff]  ;;  %1236 = vmatpush3.bf16.msra.mxu0 %v1235_v7  ;;  %v112_v18 = vld [vmem:[#allocation4 + $0x190] sm:$0xff]  ;;  %v82_v23 = vld [vmem:[#allocation4 + $0xa0] sm:$0xff] }
  0x3a   :  { %1266 = vmatprep.subr.bf16.mxu1 %v1265_v8  ;;  %v1239_v17 = vpack.c.bf16 %v65_v15, %v64_v14  ;;  %v113_v19 = vld [vmem:[#allocation4 + $0x198] sm:$0xff]  ;;  %v96_v20 = vld [vmem:[#allocation4 + $0x110] sm:$0xff]  ;;  %v83_v24 = vld [vmem:[#allocation4 + $0xa8] sm:$0xff]  ;;  %1238 = vmatprep.subr.bf16.mxu0 %v1237_v16 }
  0x3b   :  { %1268 = vmatpush3.bf16.msra.mxu1 %v1267_v12  ;;  %v1269_v21 = vpack.c.bf16 %v113_v19, %v112_v18  ;;  %v97_v22 = vld [vmem:[#allocation4 + $0x118] sm:$0xff]  ;;  %v1241_v26 = vpack.c.bf16 %v83_v24, %v82_v23  ;;  %v66_v27 = vld [vmem:[#allocation4 + $0x20] sm:$0xff]  ;;  %v67_v28 = vld [vmem:[#allocation4 + $0x28] sm:$0xff] }
  0x3c   :  { %v1271_v25 = vpack.c.bf16 %v97_v22, %v96_v20  ;;  %v114_v29 = vld [vmem:[#allocation4 + $0x1a0] sm:$0xff]  ;;  %v115_v30 = vld [vmem:[#allocation4 + $0x1a8] sm:$0xff]  ;;  %v1243_v33 = vpack.c.bf16 %v67_v28, %v66_v27  ;;  %v84_v35 = vld [vmem:[#allocation4 + $0xb0] sm:$0xff] }
  0x3d   :  { %1270 = vmatprep.subr.bf16.mxu1 %v1269_v21  ;;  %v98_v31 = vld [vmem:[#allocation4 + $0x120] sm:$0xff]  ;;  %v99_v32 = vld [vmem:[#allocation4 + $0x128] sm:$0xff]  ;;  %1240 = vmatpush3.bf16.msra.mxu0 %v1239_v17  ;;  %v1273_v34 = vpack.c.bf16 %v115_v30, %v114_v29  ;;  %v85_v36 = vld [vmem:[#allocation4 + $0xb8] sm:$0xff] }
  0x3e   :  { %v68_v37 = vld [vmem:[#allocation4 + $0x30] sm:$0xff]  ;;  %1242 = vmatprep.subr.bf16.mxu0 %v1241_v26  ;;  %v1275_v38 = vpack.c.bf16 %v99_v32, %v98_v31  ;;  %v1245_v39 = vpack.c.bf16 %v85_v36, %v84_v35  ;;  %v69_v40 = vld [vmem:[#allocation4 + $0x38] sm:$0xff]  ;;  %v86_v46 = vld [vmem:[#allocation4 + $0xc0] sm:$0xff] }
  0x3f   :  { %1272 = vmatpush3.bf16.msra.mxu1 %v1271_v25  ;;  %v116_v41 = vld [vmem:[#allocation4 + $0x1b0] sm:$0xff]  ;;  %v117_v42 = vld [vmem:[#allocation4 + $0x1b8] sm:$0xff]  ;;  %v87_v47 = vld [vmem:[#allocation4 + $0xc8] sm:$0xff]  ;;  %v1247_v48 = vpack.c.bf16 %v69_v40, %v68_v37 }
  0x40   :  { %1274 = vmatprep.subr.bf16.mxu1 %v1273_v34  ;;  %v1277_v43 = vpack.c.bf16 %v117_v42, %v116_v41  ;;  %v100_v44 = vld [vmem:[#allocation4 + $0x130] sm:$0xff]  ;;  %v101_v45 = vld [vmem:[#allocation4 + $0x138] sm:$0xff]  ;;  %v118_v49 = vld [vmem:[#allocation4 + $0x1c0] sm:$0xff]  ;;  %v1249_v52 = vpack.c.bf16 %v87_v47, %v86_v46 }
  0x41   :  { %1244 = vmatpush3.bf16.msra.mxu0 %v1243_v33  ;;  %v119_v50 = vld [vmem:[#allocation4 + $0x1c8] sm:$0xff]  ;;  %v1279_v51 = vpack.c.bf16 %v101_v45, %v100_v44  ;;  %v70_v53 = vld [vmem:[#allocation4 + $0x40] sm:$0xff]  ;;  %v88_v58 = vld [vmem:[#allocation4 + $0xd0] sm:$0xff] }
  0x42   :  { %1246 = vmatprep.subr.bf16.mxu0 %v1245_v39  ;;  %v71_v54 = vld [vmem:[#allocation4 + $0x48] sm:$0xff]  ;;  %v102_v55 = vld [vmem:[#allocation4 + $0x140] sm:$0xff]  ;;  %v1281_v56 = vpack.c.bf16 %v119_v50, %v118_v49  ;;  %v89_v59 = vld [vmem:[#allocation4 + $0xd8] sm:$0xff] }
  0x43   :  { %1276 = vmatpush3.bf16.msra.mxu1 %v1275_v38  ;;  %v103_v57 = vld [vmem:[#allocation4 + $0x148] sm:$0xff]  ;;  %v120_v60 = vld [vmem:[#allocation4 + $0x1d0] sm:$0xff]  ;;  %v121_v61 = vld [vmem:[#allocation4 + $0x1d8] sm:$0xff]  ;;  %v1251_v62 = vpack.c.bf16 %v71_v54, %v70_v53  ;;  %v1253_v0 = vpack.c.bf16 %v89_v59, %v88_v58 }
  0x44   :  { %1278 = vmatprep.subr.bf16.mxu1 %v1277_v43  ;;  %v1283_v63 = vpack.c.bf16 %v103_v57, %v102_v55  ;;  %v72_v1 = vld [vmem:[#allocation4 + $0x50] sm:$0xff]  ;;  %v73_v2 = vld [vmem:[#allocation4 + $0x58] sm:$0xff]  ;;  %v1285_v4 = vpack.c.bf16 %v121_v61, %v120_v60  ;;  %v90_v6 = vld [vmem:[#allocation4 + $0xe0] sm:$0xff] }
  0x45   :  { %1248 = vmatpush3.bf16.msra.mxu0 %v1247_v48  ;;  %v104_v3 = vld [vmem:[#allocation4 + $0x150] sm:$0xff]  ;;  %v105_v5 = vld [vmem:[#allocation4 + $0x158] sm:$0xff]  ;;  %v91_v7 = vld [vmem:[#allocation4 + $0xe8] sm:$0xff]  ;;  %v1255_v10 = vpack.c.bf16 %v73_v2, %v72_v1 }
  0x46   :  { %1250 = vmatprep.subr.bf16.mxu0 %v1249_v52  ;;  %v122_v8 = vld [vmem:[#allocation4 + $0x1e0] sm:$0xff]  ;;  %v123_v9 = vld [vmem:[#allocation4 + $0x1e8] sm:$0xff]  ;;  %v57_v12 = vld [vmem:[#allocation2 + $0x8] sm:$0xff]  ;;  %v1287_v13 = vpack.c.bf16 %v105_v5, %v104_v3  ;;  %v1257_v14 = vpack.c.bf16 %v91_v7, %v90_v6 }
  0x47   :  { %1280 = vmatpush3.bf16.msra.mxu1 %v1279_v51  ;;  %v74_v11 = vld [vmem:[#allocation4 + $0x60] sm:$0xff]  ;;  %v75_v15 = vld [vmem:[#allocation4 + $0x68] sm:$0xff]  ;;  %v1289_v18 = vpack.c.bf16 %v123_v9, %v122_v8  ;;  %v92_v19 = vld [vmem:[#allocation4 + $0xf0] sm:$0xff]  ;;  %227 = vmatprep.mubr.f32.mxu0 %v57_v12 }
  0x48   :  { %1282 = vmatprep.subr.bf16.mxu1 %v1281_v56  ;;  %v106_v16 = vld [vmem:[#allocation4 + $0x160] sm:$0xff]  ;;  %v107_v17 = vld [vmem:[#allocation4 + $0x168] sm:$0xff]  ;;  %v93_v20 = vld [vmem:[#allocation4 + $0xf8] sm:$0xff]  ;;  %v1259_v24 = vpack.c.bf16 %v75_v15, %v74_v11 }
  0x49   :  { %1252 = vmatpush3.bf16.msra.mxu0 %v1251_v62  ;;  %v59_v21 = vld [vmem:[#allocation2 + $0x18] sm:$0xff]  ;;  %v124_v22 = vld [vmem:[#allocation4 + $0x1f0] sm:$0xff]  ;;  %v125_v23 = vld [vmem:[#allocation4 + $0x1f8] sm:$0xff]  ;;  %v1291_v25 = vpack.c.bf16 %v107_v17, %v106_v16  ;;  %v1261_v26 = vpack.c.bf16 %v93_v20, %v92_v19 }
  0x4a   :  { %1254 = vmatprep.subr.bf16.mxu0 %v1253_v0  ;;  %297 = vmatprep.mubr.f32.mxu1 %v59_v21  ;;  %v76_v27 = vld [vmem:[#allocation4 + $0x70] sm:$0xff]  ;;  %v77_v28 = vld [vmem:[#allocation4 + $0x78] sm:$0xff]  ;;  %v1293_v30 = vpack.c.bf16 %v125_v23, %v124_v22  ;;  %v142_v32 = vld [vmem:[#allocation4 + $0x280] sm:$0xff] }
  0x4b   :  { %1284 = vmatpush3.bf16.msra.mxu1 %v1283_v63  ;;  %v108_v29 = vld [vmem:[#allocation4 + $0x170] sm:$0xff]  ;;  %v109_v31 = vld [vmem:[#allocation4 + $0x178] sm:$0xff]  ;;  %v143_v33 = vld [vmem:[#allocation4 + $0x288] sm:$0xff]  ;;  %v1263_v34 = vpack.c.bf16 %v77_v28, %v76_v27 }
  0x4c   :  { %1286 = vmatprep.subr.bf16.mxu1 %v1285_v4  ;;  %v1295_v35 = vpack.c.bf16 %v109_v31, %v108_v29  ;;  %v1297_v36 = vpack.c.bf16 %v143_v33, %v142_v32  ;;  %v126_v37 = vld [vmem:[#allocation4 + $0x200] sm:$0xff]  ;;  %v127_v38 = vld [vmem:[#allocation4 + $0x208] sm:$0xff]  ;;  %v144_v39 = vld [vmem:[#allocation4 + $0x290] sm:$0xff] }
  0x4d   :  { %1256 = vmatpush3.bf16.msra.mxu0 %v1255_v10  ;;  %v145_v40 = vld [vmem:[#allocation4 + $0x298] sm:$0xff]  ;;  %v56_v41 = vld [vmem:[#allocation2] sm:$0xff]  ;;  %v1299_v42 = vpack.c.bf16 %v127_v38, %v126_v37  ;;  %v58_v43 = vld [vmem:[#allocation2 + $0x10] sm:$0xff] }
  0x4e   :  { %1258 = vmatprep.subr.bf16.mxu0 %v1257_v14  ;;  %v1301_v44 = vpack.c.bf16 %v145_v40, %v144_v39  ;;  %v128_v45 = vld [vmem:[#allocation4 + $0x210] sm:$0xff]  ;;  %v129_v46 = vld [vmem:[#allocation4 + $0x218] sm:$0xff]  ;;  %v146_v47 = vld [vmem:[#allocation4 + $0x2a0] sm:$0xff] }
  0x4f   :  { %1288 = vmatpush3.bf16.msra.mxu1 %v1287_v13  ;;  %v147_v48 = vld [vmem:[#allocation4 + $0x2a8] sm:$0xff]  ;;  %v61_v49 = vld [vmem:[#allocation2 + $0x28] sm:$0xff]  ;;  %v1303_v50 = vpack.c.bf16 %v129_v46, %v128_v45  ;;  %v130_v52 = vld [vmem:[#allocation4 + $0x220] sm:$0xff]  ;;  %v1546_v46 = vmov 0.0  }
  0x50   :  { %1290 = vmatprep.subr.bf16.mxu1 %v1289_v18  ;;  %v1305_v51 = vpack.c.bf16 %v147_v48, %v146_v47  ;;  %v131_v53 = vld [vmem:[#allocation4 + $0x228] sm:$0xff]  ;;  %v148_v54 = vld [vmem:[#allocation4 + $0x2b0] sm:$0xff]  ;;  %v149_v55 = vld [vmem:[#allocation4 + $0x2b8] sm:$0xff] }
  0x51   :  { %1260 = vmatpush3.bf16.msra.mxu0 %v1259_v24  ;;  %v1307_v56 = vpack.c.bf16 %v131_v53, %v130_v52  ;;  %v1309_v57 = vpack.c.bf16 %v149_v55, %v148_v54  ;;  %v132_v58 = vld [vmem:[#allocation4 + $0x230] sm:$0xff]  ;;  %v133_v59 = vld [vmem:[#allocation4 + $0x238] sm:$0xff]  ;;  %v150_v60 = vld [vmem:[#allocation4 + $0x2c0] sm:$0xff] }
  0x52   :  { %1262 = vmatprep.subr.bf16.mxu0 %v1261_v26  ;;  %v151_v61 = vld [vmem:[#allocation4 + $0x2c8] sm:$0xff]  ;;  %v1311_v62 = vpack.c.bf16 %v133_v59, %v132_v58  ;;  %v134_v0 = vld [vmem:[#allocation4 + $0x240] sm:$0xff]  ;;  %v152_v2 = vld [vmem:[#allocation4 + $0x2d0] sm:$0xff] }
  0x53   :  { %1292 = vmatpush3.bf16.msra.mxu1 %v1291_v25  ;;  %v1313_v63 = vpack.c.bf16 %v151_v61, %v150_v60  ;;  %v135_v1 = vld [vmem:[#allocation4 + $0x248] sm:$0xff]  ;;  %v153_v3 = vld [vmem:[#allocation4 + $0x2d8] sm:$0xff]  ;;  %v136_v6 = vld [vmem:[#allocation4 + $0x250] sm:$0xff]  ;;  %v1544_v25 = vmov 0.0|0.0  }
  0x54   :  { %1294 = vmatprep.subr.bf16.mxu1 %v1293_v30  ;;  %v1315_v4 = vpack.c.bf16 %v135_v1, %v134_v0  ;;  %v1317_v5 = vpack.c.bf16 %v153_v3, %v152_v2  ;;  %v137_v7 = vld [vmem:[#allocation4 + $0x258] sm:$0xff]  ;;  %v154_v8 = vld [vmem:[#allocation4 + $0x2e0] sm:$0xff]  ;;  %v155_v9 = vld [vmem:[#allocation4 + $0x2e8] sm:$0xff] }
  0x55   :  { %1264 = vmatpush3.bf16.msra.mxu0 %v1263_v34  ;;  %v1319_v10 = vpack.c.bf16 %v137_v7, %v136_v6  ;;  %v1321_v11 = vpack.c.bf16 %v155_v9, %v154_v8  ;;  %v138_v12 = vld [vmem:[#allocation4 + $0x260] sm:$0xff]  ;;  %v139_v13 = vld [vmem:[#allocation4 + $0x268] sm:$0xff]  ;;  %v156_v14 = vld [vmem:[#allocation4 + $0x2f0] sm:$0xff] }
  0x56   :  { %1298 = vmatprep.subr.bf16.mxu0 %v1297_v36  ;;  %v157_v15 = vld [vmem:[#allocation4 + $0x2f8] sm:$0xff]  ;;  %v1323_v16 = vpack.c.bf16 %v139_v13, %v138_v12  ;;  %v140_v18 = vld [vmem:[#allocation4 + $0x270] sm:$0xff]  ;;  %v374_v22 = vld [vmem:[#allocation6] sm:$0xff] }
  0x57   :  { %1296 = vmatpush3.bf16.msra.mxu1 %v1295_v35  ;;  %v1325_v17 = vpack.c.bf16 %v157_v15, %v156_v14  ;;  %v141_v19 = vld [vmem:[#allocation4 + $0x278] sm:$0xff]  ;;  %v60_v21 = vld [vmem:[#allocation2 + $0x20] sm:$0xff]  ;;  %v375_v23 = vld [vmem:[#allocation6 + $0x8] sm:$0xff] }
  0x58   :  { %228 = vmatmul.mubr.f32.vlgmr.msra.gmra.mrb[0].mxu0 %v56_v41  ;;  %v1327_v20 = vpack.c.bf16 %v141_v19, %v140_v18  ;;  %v376_v24 = vld [vmem:[#allocation6 + $0x10] sm:$0xff]  ;;  %1329 = vmatprep.subr.bf16.mxu1 %v1544_v25  ;;  %v1330_v26 = vpack.c.bf16 %v375_v23, %v374_v22  ;;  %v377_v27 = vld [vmem:[#allocation6 + $0x18] sm:$0xff]  ;;  %v378_v29 = vld [vmem:[#allocation6 + $0x20] sm:$0xff] }
  0x59   :  { %1300 = vmatpush3.bf16.msra.mxu0 %v1299_v42  ;;  %367 = vmatprep.mubr.f32.mxu0 %v61_v49  ;;  %v1333_v28 = vpack.c.bf16 %v377_v27, %v376_v24  ;;  %v379_v30 = vld [vmem:[#allocation6 + $0x28] sm:$0xff]  ;;  %v380_v32 = vld [vmem:[#allocation6 + $0x30] sm:$0xff]  ;;  %v381_v33 = vld [vmem:[#allocation6 + $0x38] sm:$0xff] }
  0x5a   :  { %298 = vmatmul.mubr.f32.vlgmr.msra.gmra.mrb[0].mxu1 %v58_v43  ;;  %1302 = vmatprep.subr.bf16.mxu0 %v1301_v44  ;;  %v1336_v31 = vpack.c.bf16 %v379_v30, %v378_v29  ;;  %v1339_v34 = vpack.c.bf16 %v381_v33, %v380_v32  ;;  %v382_v35 = vld [vmem:[#allocation6 + $0x40] sm:$0xff]  ;;  %v383_v36 = vld [vmem:[#allocation6 + $0x48] sm:$0xff]  ;;  %v384_v38 = vld [vmem:[#allocation6 + $0x50] sm:$0xff] }
  0x5b   :  { %1331 = vmatpush3.bf16.msra.mxu1 %v1330_v26  ;;  %v1342_v37 = vpack.c.bf16 %v383_v36, %v382_v35  ;;  %v385_v39 = vld [vmem:[#allocation6 + $0x58] sm:$0xff]  ;;  %v386_v41 = vld [vmem:[#allocation6 + $0x60] sm:$0xff]  ;;  %v387_v42 = vld [vmem:[#allocation6 + $0x68] sm:$0xff]  ;;  %1090 = vmatprep.mubr.msk.f32.mxu1 %vm1545_vm0, %v1546_v46 }
  0x5c   :  { %1332 = vmatprep.subr.bf16.mxu1 %v1544_v25  ;;  %v1345_v40 = vpack.c.bf16 %v385_v39, %v384_v38  ;;  %v1348_v43 = vpack.c.bf16 %v387_v42, %v386_v41  ;;  %v388_v44 = vld [vmem:[#allocation6 + $0x70] sm:$0xff]  ;;  %v389_v45 = vld [vmem:[#allocation6 + $0x78] sm:$0xff]  ;;  %v467_v48 = vld [vmem:[#allocation6 + $0x80] sm:$0xff] }
  0x5d   :  { %1304 = vmatpush3.bf16.msra.mxu0 %v1303_v50  ;;  %v1351_v47 = vpack.c.bf16 %v389_v45, %v388_v44  ;;  %v468_v49 = vld [vmem:[#allocation6 + $0x88] sm:$0xff]  ;;  %v469_v50 = vld [vmem:[#allocation6 + $0x90] sm:$0xff]  ;;  %v470_v52 = vld [vmem:[#allocation6 + $0x98] sm:$0xff] }
  0x5e   :  { %1306 = vmatprep.subr.bf16.mxu0 %v1305_v51  ;;  %v1354_v51 = vpack.c.bf16 %v468_v49, %v467_v48  ;;  %v1357_v53 = vpack.c.bf16 %v470_v52, %v469_v50  ;;  %v471_v54 = vld [vmem:[#allocation6 + $0xa0] sm:$0xff]  ;;  %v472_v55 = vld [vmem:[#allocation6 + $0xa8] sm:$0xff]  ;;  %v474_v58 = vld [vmem:[#allocation6 + $0xb8] sm:$0xff] }
  0x5f   :  { %1334 = vmatpush3.bf16.msra.mxu1 %v1333_v28  ;;  %v475_v60 = vld [vmem:[#allocation6 + $0xc0] sm:$0xff]  ;;  %v476_v61 = vld [vmem:[#allocation6 + $0xc8] sm:$0xff]  ;;  %v860_v0 = vld [vmem:[%s1694_s3] ss:$0 sm:$0xff] }
  0x60   :  { %1335 = vmatprep.subr.bf16.mxu1 %v1544_v25  ;;  %v477_v13 = vld [vmem:[#allocation6 + $0xd0] sm:$0xff]  ;;  %v478_v14 = vld [vmem:[#allocation6 + $0xd8] sm:$0xff]  ;;  %v560_v22 = vld [vmem:[#allocation6 + $0x100] sm:$0xff] }
  0x61   :  { %1308 = vmatpush3.bf16.msra.mxu0 %v1307_v56  ;;  %v1360_v56 = vpack.c.bf16 %v472_v55, %v471_v54  ;;  %v1369_v15 = vpack.c.bf16 %v478_v14, %v477_v13  ;;  %v481_v19 = vld [vmem:[#allocation6 + $0xf0] sm:$0xff]  ;;  %v561_v23 = vld [vmem:[#allocation6 + $0x108] sm:$0xff]  ;;  %v563_v27 = vld [vmem:[#allocation6 + $0x118] sm:$0xff] }
  0x62   :  { %1310 = vmatprep.subr.bf16.mxu0 %v1309_v57  ;;  %v473_v57 = vld [vmem:[#allocation6 + $0xb0] sm:$0xff]  ;;  %v1378_v26 = vpack.c.bf16 %v561_v23, %v560_v22  ;;  %v564_v29 = vld [vmem:[#allocation6 + $0x120] sm:$0xff]  ;;  %v565_v30 = vld [vmem:[#allocation6 + $0x128] sm:$0xff] }
  0x63   :  { %1337 = vmatpush3.bf16.msra.mxu1 %v1336_v31  ;;  %v1363_v59 = vpack.c.bf16 %v474_v58, %v473_v57  ;;  %v562_v24 = vld [vmem:[#allocation6 + $0x110] sm:$0xff]  ;;  %v1384_v31 = vpack.c.bf16 %v565_v30, %v564_v29  ;;  %v567_v33 = vld [vmem:[#allocation6 + $0x138] sm:$0xff]  ;;  %v568_v35 = vld [vmem:[#allocation6 + $0x140] sm:$0xff] }
  0x64   :  { %1338 = vmatprep.subr.bf16.mxu1 %v1544_v25  ;;  %v1381_v28 = vpack.c.bf16 %v563_v27, %v562_v24  ;;  %v566_v32 = vld [vmem:[#allocation6 + $0x130] sm:$0xff]  ;;  %v569_v36 = vld [vmem:[#allocation6 + $0x148] sm:$0xff]  ;;  %v571_v44 = vld [vmem:[#allocation6 + $0x158] sm:$0xff] }
  0x65   :  { %1312 = vmatpush3.bf16.msra.mxu0 %v1311_v62  ;;  %v1366_v62 = vpack.c.bf16 %v476_v61, %v475_v60  ;;  %v861_v38 = vld [vmem:[%s1694_s3 + $0x1] ss:$0 sm:$0xff]  ;;  %v573_v48 = vld [vmem:[#allocation6 + $0x168] sm:$0xff]  ;;  %v656_v57 = vld [vmem:[#allocation6 + $0x198] sm:$0xff] }
  0x66   :  { %1314 = vmatprep.subr.bf16.mxu0 %v1313_v63  ;;  %v574_v50 = vld [vmem:[#allocation6 + $0x170] sm:$0xff]  ;;  %v654_v54 = vld [vmem:[#allocation6 + $0x188] sm:$0xff]  ;;  %v750_v23 = vld [vmem:[#allocation6 + $0x220] sm:$0xff] }
  0x67   :  { %1340 = vmatpush3.bf16.msra.mxu1 %v1339_v34  ;;  %v1387_v34 = vpack.c.bf16 %v567_v33, %v566_v32  ;;  %v655_v55 = vld [vmem:[#allocation6 + $0x190] sm:$0xff]  ;;  %v658_v60 = vld [vmem:[#allocation6 + $0x1a8] sm:$0xff]  ;;  %v754_v30 = vld [vmem:[#allocation6 + $0x240] sm:$0xff] }
  0x68   :  { %1341 = vmatprep.subr.bf16.mxu1 %v1544_v25  ;;  %v1405_v58 = vpack.c.bf16 %v656_v57, %v655_v55  ;;  %v666_v13 = vld [vmem:[#allocation6 + $0x1e8] sm:$0xff]  ;;  %v752_v27 = vld [vmem:[#allocation6 + $0x230] sm:$0xff] }
  0x69   :  { %1316 = vmatpush3.bf16.msra.mxu0 %v1315_v4  ;;  %v751_v24 = vld [vmem:[#allocation6 + $0x228] sm:$0xff]  ;;  %v863_v33 = vld [vmem:[%s1694_s3 + $0x3] ss:$0 sm:$0xff] }
  0x6a   :  { %1318 = vmatprep.subr.bf16.mxu0 %v1317_v5 }
  0x6b   :  { %1343 = vmatpush3.bf16.msra.mxu1 %v1342_v37  ;;  %v1390_v37 = vpack.c.bf16 %v569_v36, %v568_v35 }
  0x6c   :  { %1344 = vmatprep.subr.bf16.mxu1 %v1544_v25 }
  0x6d   :  { %1320 = vmatpush3.bf16.msra.mxu0 %v1319_v10 }
  0x6e   :  { %1322 = vmatprep.subr.bf16.mxu0 %v1321_v11 }
  0x6f   :  { %1346 = vmatpush3.bf16.msra.mxu1 %v1345_v40 }
  0x70   :  { %1347 = vmatprep.subr.bf16.mxu1 %v1544_v25 }
  0x71   :  { %1324 = vmatpush3.bf16.msra.mxu0 %v1323_v16  ;;  %v479_v16 = vld [vmem:[#allocation6 + $0xe0] sm:$0xff] }
  0x72   :  { %1326 = vmatprep.subr.bf16.mxu0 %v1325_v17  ;;  %v480_v17 = vld [vmem:[#allocation6 + $0xe8] sm:$0xff] }
  0x73   :  { %1349 = vmatpush3.bf16.msra.mxu1 %v1348_v43  ;;  %v1372_v18 = vpack.c.bf16 %v480_v17, %v479_v16  ;;  %v570_v43 = vld [vmem:[#allocation6 + $0x150] sm:$0xff]  ;;  %v668_v16 = vld [vmem:[#allocation6 + $0x1f8] sm:$0xff] }
  0x74   :  { %1350 = vmatprep.subr.bf16.mxu1 %v1544_v25  ;;  %v1393_v45 = vpack.c.bf16 %v571_v44, %v570_v43  ;;  %v760_v44 = vld [vmem:[#allocation6 + $0x270] sm:$0xff] }
  0x75   :  { %1328 = vmatpush3.bf16.msra.mxu0 %v1327_v20  ;;  %v482_v20 = vld [vmem:[#allocation6 + $0xf8] sm:$0xff] }
  0x76   :  { %1353 = vmatprep.subr.bf16.mxu0 %v1544_v25 }
  0x77   :  { %1352 = vmatpush3.bf16.msra.mxu1 %v1351_v47  ;;  %v572_v47 = vld [vmem:[#allocation6 + $0x160] sm:$0xff] }
  0x78   :  { %368 = vmatmul.mubr.f32.vlgmr.msra.gmra.mrb[2].mxu0 %v60_v21  ;;  %1377 = vmatprep.subr.bf16.mxu1 %v1544_v25  ;;  %v1375_v21 = vpack.c.bf16 %v482_v20, %v481_v19  ;;  %v1396_v49 = vpack.c.bf16 %v573_v48, %v572_v47  ;;  %v747_v19 = vld [vmem:[#allocation6 + $0x208] sm:$0xff]  ;;  %v748_v20 = vld [vmem:[#allocation6 + $0x210] sm:$0xff] }
  0x79   :  { %1125 = vmatprep.mubr.msk.f32.mxu0 %vm1545_vm0, %v1546_v46  ;;  %1355 = vmatpush3.bf16.msra.mxu0 %v1354_v51  ;;  %v575_v51 = vld [vmem:[#allocation6 + $0x178] sm:$0xff]  ;;  %v864_v48 = vld [vmem:[%s1694_s3 + $0x4] ss:$0 sm:$0xff] }
  0x7a   :  { %1356 = vmatprep.subr.bf16.mxu0 %v1544_v25  ;;  %v1399_v52 = vpack.c.bf16 %v575_v51, %v574_v50 }
  0x7d   :  { %1358 = vmatpush3.bf16.msra.mxu0 %v1357_v53  ;;  %v653_v53 = vld [vmem:[#allocation6 + $0x180] sm:$0xff] }
  0x7e   :  { %1359 = vmatprep.subr.bf16.mxu0 %v1544_v25 }
  0x81   :  { %1361 = vmatpush3.bf16.msra.mxu0 %v1360_v56  ;;  %v1402_v56 = vpack.c.bf16 %v654_v54, %v653_v53  ;;  %v865_v53 = vld [vmem:[%s1694_s3 + $0x5] ss:$0 sm:$0xff] }
  0x82   :  { %1362 = vmatprep.subr.bf16.mxu0 %v1544_v25 }
  0x85   :  { %1364 = vmatpush3.bf16.msra.mxu0 %v1363_v59  ;;  %v657_v59 = vld [vmem:[#allocation6 + $0x1a0] sm:$0xff] }
  0x86   :  { %1365 = vmatprep.subr.bf16.mxu0 %v1544_v25  ;;  %v1408_v61 = vpack.c.bf16 %v658_v60, %v657_v59  ;;  %v867_v59 = vld [vmem:[%s1694_s3 + $0x7] ss:$0 sm:$0xff] }
  0x89   :  { %1367 = vmatpush3.bf16.msra.mxu0 %v1366_v62  ;;  %v659_v62 = vld [vmem:[#allocation6 + $0x1b0] sm:$0xff] }
  0x8a   :  { %1368 = vmatprep.subr.bf16.mxu0 %v1544_v25 }
  0x8d   :  { %1370 = vmatpush3.bf16.msra.mxu0 %v1369_v15  ;;  %v667_v15 = vld [vmem:[#allocation6 + $0x1f0] sm:$0xff] }
  0x8e   :  { %1371 = vmatprep.subr.bf16.mxu0 %v1544_v25  ;;  %v1423_v17 = vpack.c.bf16 %v668_v16, %v667_v15 }
  0x91   :  { %1373 = vmatpush3.bf16.msra.mxu0 %v1372_v18  ;;  %v746_v18 = vld [vmem:[#allocation6 + $0x200] sm:$0xff] }
  0x92   :  { %1374 = vmatprep.subr.bf16.mxu0 %v1544_v25 }
  0x95   :  { %1376 = vmatpush3.bf16.msra.mxu0 %v1375_v21  ;;  %v749_v21 = vld [vmem:[#allocation6 + $0x218] sm:$0xff] }
  0x96   :  { %1401 = vmatprep.subr.bf16.mxu0 %v1544_v25  ;;  %v1429_v22 = vpack.c.bf16 %v749_v21, %v748_v20 }
 0x12b   :  { %v900_v63 = vpop.f32.mrb[0].mxu0 }
 0x12c   :  { %v901_v1 = vpop.f32.mrb[1].mxu0 }
 0x12d   :  { %v935_v2 = vpop.f32.mrb[0].mxu1  ;;  %v902_v3 = vadd.f32 %v901_v1, %v900_v63  ;;  %v660_v63 = vld [vmem:[#allocation6 + $0x1b8] sm:$0xff]  ;;  %v661_v1 = vld [vmem:[#allocation6 + $0x1c0] sm:$0xff] }
 0x12e   :  { %v936_v4 = vpop.f32.mrb[1].mxu1 }
 0x12f   :  { %v937_v5 = vadd.f32 %v936_v4, %v935_v2  ;;  %v230_v6 = vadd.f32 %v902_v3, %v860_v0  ;;  %v1411_v0 = vpack.c.bf16 %v660_v63, %v659_v62  ;;  %v662_v2 = vld [vmem:[#allocation6 + $0x1c8] sm:$0xff]  ;;  %v862_v4 = vld [vmem:[%s1694_s3 + $0x2] ss:$0 sm:$0xff] }
 0x130   :  { %v1414_v3 = vpack.c.bf16 %v662_v2, %v661_v1 }
 0x131   :  { %v300_v7 = vadd.f32 %v937_v5, %v230_v6 }
 0x14b   :  { %v970_v8 = vpop.f32.mrb[2].mxu0 }
 0x14c   :  { %v971_v9 = vpop.f32.mrb[3].mxu0 }
 0x14d   :  { %v972_v10 = vadd.f32 %v971_v9, %v970_v8  ;;  %v663_v9 = vld [vmem:[#allocation6 + $0x1d0] sm:$0xff] }
 0x14f   :  { %v370_v11 = vadd.f32 %v972_v10, %v300_v7  ;;  %v664_v10 = vld [vmem:[#allocation6 + $0x1d8] sm:$0xff] }
 0x151   :  { %1457 = vtanh.f32 %v370_v11  ;;  %v1417_v11 = vpack.c.bf16 %v664_v10, %v663_v9 }
 0x15b   :  { %v1458_v12 = vpop.eup %1457 }
 0x15c   :  { %1091 = vmatmul.mubr.f32.vlgmr.msra.gmra.mrb[2].mxu1 %v1458_v12  ;;  %v665_v12 = vld [vmem:[#allocation6 + $0x1e0] sm:$0xff] }
 0x15d   :  { %1160 = vmatprep.mubr.msk.f32.mxu1 %vm1545_vm0, %v1546_v46  ;;  %1379 = vmatpush3.bf16.msra.mxu1 %v1378_v26  ;;  %v1420_v14 = vpack.c.bf16 %v666_v13, %v665_v12  ;;  %v1432_v26 = vpack.c.bf16 %v751_v24, %v750_v23 }
 0x15e   :  { %1380 = vmatprep.subr.bf16.mxu1 %v1544_v25 }
 0x161   :  { %1382 = vmatpush3.bf16.msra.mxu1 %v1381_v28  ;;  %v753_v28 = vld [vmem:[#allocation6 + $0x238] sm:$0xff] }
 0x162   :  { %1383 = vmatprep.subr.bf16.mxu1 %v1544_v25  ;;  %v1435_v29 = vpack.c.bf16 %v753_v28, %v752_v27 }
 0x165   :  { %1385 = vmatpush3.bf16.msra.mxu1 %v1384_v31  ;;  %v755_v31 = vld [vmem:[#allocation6 + $0x248] sm:$0xff] }
 0x166   :  { %1386 = vmatprep.subr.bf16.mxu1 %v1544_v25  ;;  %v1438_v32 = vpack.c.bf16 %v755_v31, %v754_v30 }
 0x169   :  { %1388 = vmatpush3.bf16.msra.mxu1 %v1387_v34 }
 0x16a   :  { %1389 = vmatprep.subr.bf16.mxu1 %v1544_v25 }
 0x16d   :  { %1391 = vmatpush3.bf16.msra.mxu1 %v1390_v37 }
 0x16e   :  { %1392 = vmatprep.subr.bf16.mxu1 %v1544_v25 }
 0x171   :  { %1394 = vmatpush3.bf16.msra.mxu1 %v1393_v45  ;;  %v761_v45 = vld [vmem:[#allocation6 + $0x278] sm:$0xff] }
 0x172   :  { %1395 = vmatprep.subr.bf16.mxu1 %v1544_v25  ;;  %v1447_v47 = vpack.c.bf16 %v761_v45, %v760_v44 }
 0x175   :  { %1397 = vmatpush3.bf16.msra.mxu1 %v1396_v49 }
 0x176   :  { %1398 = vmatprep.subr.bf16.mxu1 %v1544_v25 }
 0x179   :  { %1400 = vmatpush3.bf16.msra.mxu1 %v1399_v52 }
 0x17a   :  { %1425 = vmatprep.subr.bf16.mxu1 %v1544_v25 }
 0x22f   :  { %v461_v39 = vpop.f32.mrb[2].mxu1 }
 0x230   :  { %v462_v40 = vadd.f32 %v861_v38, %v461_v39  ;;  %v1092_v41 = vpop.f32.mrb[3].mxu1  ;;  %v756_v38 = vld [vmem:[#allocation6 + $0x250] sm:$0xff]  ;;  %v757_v39 = vld [vmem:[#allocation6 + $0x258] sm:$0xff] }
 0x231   :  { %v758_v41 = vld [vmem:[#allocation6 + $0x260] sm:$0xff] }
 0x232   :  { %1459 = vtanh.f32 %v462_v40  ;;  %v1441_v40 = vpack.c.bf16 %v757_v39, %v756_v38 }
 0x23c   :  { %v1460_v42 = vpop.eup %1459 }
 0x23d   :  { %1126 = vmatmul.mubr.f32.vlgmr.msra.gmra.mrb[4].mxu0 %v1460_v42  ;;  %v759_v42 = vld [vmem:[#allocation6 + $0x268] sm:$0xff] }
 0x23e   :  { %1195 = vmatprep.mubr.msk.f32.mxu0 %vm1545_vm0, %v1546_v46  ;;  %1403 = vmatpush3.bf16.msra.mxu0 %v1402_v56  ;;  %v1444_v43 = vpack.c.bf16 %v759_v42, %v758_v41 }
 0x23f   :  { %1404 = vmatprep.subr.bf16.mxu0 %v1544_v25 }
 0x242   :  { %1406 = vmatpush3.bf16.msra.mxu0 %v1405_v58 }
 0x243   :  { %1407 = vmatprep.subr.bf16.mxu0 %v1544_v25 }
 0x246   :  { %1409 = vmatpush3.bf16.msra.mxu0 %v1408_v61 }
 0x247   :  { %1410 = vmatprep.subr.bf16.mxu0 %v1544_v25 }
 0x24a   :  { %1412 = vmatpush3.bf16.msra.mxu0 %v1411_v0 }
 0x24b   :  { %1413 = vmatprep.subr.bf16.mxu0 %v1544_v25 }
 0x24e   :  { %1415 = vmatpush3.bf16.msra.mxu0 %v1414_v3 }
 0x24f   :  { %1416 = vmatprep.subr.bf16.mxu0 %v1544_v25 }
 0x252   :  { %1418 = vmatpush3.bf16.msra.mxu0 %v1417_v11 }
 0x253   :  { %1419 = vmatprep.subr.bf16.mxu0 %v1544_v25 }
 0x256   :  { %1421 = vmatpush3.bf16.msra.mxu0 %v1420_v14 }
 0x257   :  { %1422 = vmatprep.subr.bf16.mxu0 %v1544_v25 }
 0x25a   :  { %1424 = vmatpush3.bf16.msra.mxu0 %v1423_v17 }
 0x310   :  { %v554_v5 = vpop.f32.mrb[4].mxu0 }
 0x311   :  { %v555_v6 = vadd.f32 %v862_v4, %v554_v5  ;;  %v1127_v7 = vpop.f32.mrb[5].mxu0 }
 0x313   :  { %1461 = vtanh.f32 %v555_v6 }
 0x31d   :  { %v1462_v8 = vpop.eup %1461 }
 0x31e   :  { %1161 = vmatmul.mubr.f32.vlgmr.msra.gmra.mrb[4].mxu1 %v1462_v8 }
 0x31f   :  { %1230 = vmatprep.mubr.msk.f32.mxu1 %vm1545_vm0, %v1546_v46  ;;  %v1426_v46 = vpack.c.bf16 %v747_v19, %v746_v18 }
 0x321   :  { %1427 = vmatpush3.bf16.msra.mxu1 %v1426_v46 }
 0x322   :  { %1428 = vmatprep.subr.bf16.mxu1 %v1544_v25 }
 0x325   :  { %1430 = vmatpush3.bf16.msra.mxu1 %v1429_v22 }
 0x326   :  { %1431 = vmatprep.subr.bf16.mxu1 %v1544_v25 }
 0x329   :  { %1433 = vmatpush3.bf16.msra.mxu1 %v1432_v26 }
 0x32a   :  { %1434 = vmatprep.subr.bf16.mxu1 %v1544_v25 }
 0x32d   :  { %1436 = vmatpush3.bf16.msra.mxu1 %v1435_v29 }
 0x32e   :  { %1437 = vmatprep.subr.bf16.mxu1 %v1544_v25 }
 0x331   :  { %1439 = vmatpush3.bf16.msra.mxu1 %v1438_v32 }
 0x332   :  { %1440 = vmatprep.subr.bf16.mxu1 %v1544_v25 }
 0x335   :  { %1442 = vmatpush3.bf16.msra.mxu1 %v1441_v40 }
 0x336   :  { %1443 = vmatprep.subr.bf16.mxu1 %v1544_v25 }
 0x339   :  { %1445 = vmatpush3.bf16.msra.mxu1 %v1444_v43 }
 0x33a   :  { %1446 = vmatprep.subr.bf16.mxu1 %v1544_v25  ;;  %v866_v25 = vld [vmem:[%s1694_s3 + $0x6] ss:$0 sm:$0xff] }
 0x33d   :  { %1448 = vmatpush3.bf16.msra.mxu1 %v1447_v47 }
 0x3f1   :  { %v647_v34 = vpop.f32.mrb[4].mxu1 }
 0x3f2   :  { %v648_v35 = vadd.f32 %v863_v33, %v647_v34  ;;  %v1162_v36 = vpop.f32.mrb[5].mxu1 }
 0x3f4   :  { %1463 = vtanh.f32 %v648_v35 }
 0x3fe   :  { %v1464_v37 = vpop.eup %1463 }
 0x3ff   :  { %1196 = vmatmul.mubr.f32.vlgmr.msra.gmra.mrb[6].mxu0 %v1464_v37 }
 0x4d2   :  { %v740_v49 = vpop.f32.mrb[6].mxu0 }
 0x4d3   :  { %v741_v50 = vadd.f32 %v864_v48, %v740_v49  ;;  %v1197_v51 = vpop.f32.mrb[7].mxu0 }
 0x4d5   :  { %1465 = vtanh.f32 %v741_v50 }
 0x4df   :  { %v1466_v52 = vpop.eup %1465 }
 0x4e0   :  { %1231 = vmatmul.mubr.f32.vlgmr.msra.gmra.mrb[6].mxu1 %v1466_v52 }
 0x5b3   :  { %v833_v54 = vpop.f32.mrb[6].mxu1 }
 0x5b4   :  { %v834_v55 = vadd.f32 %v865_v53, %v833_v54  ;;  %v1232_v56 = vpop.f32.mrb[7].mxu1 }
 0x5b6   :  { %1467 = vtanh.f32 %v834_v55 }
 0x5c0   :  { %v1468_v57 = vpop.eup %1467 }
 0x5c1   :  { %v844_v58 = vmul.f32 %v1468_v57, %v866_v25 }
 0x5c3   :  { %845 = vadd.xlane.f32.xlu0 %v844_v58 }
 0x650   :  { %v846_v60 = vpop.xlane.xlu0 %845 }
 0x651   :  { %v851_v61 = vadd.f32 %v867_v59, %v846_v60 }
 0x653   :  { %853 = vst.msk [vmem:[%s1695_s4] sm:$0xff] %vm852_vm1, %v851_v61 }
 0x654   :  { %858 = vsyncpa [#allocation3], 1 }
 0x655   :  { %859 = vsyncpa [#allocation5], 1 }

</bundles_post_ra>
